<compile_context>
chip_gen: v7x
topology: tpu7x:2x2x1
jax: 0.10.0
libtpu: 0.0.40
codegen_flags: <defaults>
</compile_context>

<pallas_src>
import functools

import jax
import jax.numpy as jnp
from jax import lax
from jax.experimental import pallas as pl
from jax.experimental.pallas import tpu as pltpu

EPS = 1e-5


def _basic_block_kernel(x_ref, bw1_ref, g1_ref, b1_ref, bw2_ref, g2_ref, b2_ref,
                        bmat_ref, out_ref, *, N, H, W, P):
    # x_ref   : (M, L) f32      lane-dense input, M = N*H rows, lane = c*W + w
    # bw*_ref : (3, L, L) bf16  banded conv weights (one (L,L) block per kh)
    # g*/b*   : (1, L) f32      BN affine params, pre-expanded to lane layout
    # bmat    : (L, L) f32      per-channel block-averaging matrix (1/(N*H*W))
    # out_ref : (M, L) f32
    M = N * H
    L = P * W

    # Image-row boundary masks (computed once, reused by both convs).
    # Flat row m corresponds to image row h = m % H of sample n = m // H.
    h_idx = lax.broadcasted_iota(jnp.int32, (M, L), 0) % H
    not_top = h_idx != 0          # rows with a valid row above (h - 1)
    not_bot = h_idx != (H - 1)    # rows with a valid row below (h + 1)

    def conv3x3(a, bw_ref):
        # a: (M, L) f32.  W-direction zero padding lives inside the banded
        # weights; the H direction is a cyclic sublane roll + boundary mask.
        up = jnp.where(not_top, pltpu.roll(a, shift=1, axis=0), 0.0)      # row h-1
        dn = jnp.where(not_bot, pltpu.roll(a, shift=M - 1, axis=0), 0.0)  # row h+1
        acc = jnp.dot(a.astype(jnp.bfloat16), bw_ref[1],
                      preferred_element_type=jnp.float32)
        acc += jnp.dot(up.astype(jnp.bfloat16), bw_ref[0],
                       preferred_element_type=jnp.float32)
        acc += jnp.dot(dn.astype(jnp.bfloat16), bw_ref[2],
                       preferred_element_type=jnp.float32)
        return acc

    def batchnorm(y, g_ref, b_ref):
        # Training-mode BatchNorm2d, f32 stats (biased variance, eps=1e-5).
        # Row-reduce first, then one tiny (2,L)@(L,L) dot: mean / E[y^2] come
        # back already broadcast onto the lane layout.
        s = jnp.sum(y, axis=0, keepdims=True)                       # (1, L)
        sq = jnp.sum(y * y, axis=0, keepdims=True)                  # (1, L)
        stats = jnp.dot(jnp.concatenate([s, sq], axis=0), bmat_ref[...],
                        preferred_element_type=jnp.float32)         # (2, L)
        mean_l = stats[0:1, :]
        var_l = stats[1:2, :] - mean_l * mean_l
        scale = g_ref[...] * lax.rsqrt(var_l + EPS)                 # (1, L)
        shift = b_ref[...] - mean_l * scale                         # (1, L)
        return y * scale + shift                                    # 2 ops/elem

    x = x_ref[...]                                                  # (M, L) f32

    # conv1 -> bn1 -> relu
    h1 = jnp.maximum(batchnorm(conv3x3(x, bw1_ref), g1_ref, b1_ref), 0.0)
    # conv2 -> bn2
    h2 = batchnorm(conv3x3(h1, bw2_ref), g2_ref, b2_ref)
    # identity shortcut (stride=1, in_planes == planes) + relu
    out_ref[...] = jnp.maximum(h2 + x, 0.0)


def _banded_conv_weight(w_oihw, width):
    """PyTorch OIHW 3x3 weight -> (3, Cin*width, Cout*width) banded matrices.

    bw[kh, c*width + w_in, p*width + w_out] = w[p, c, kh, w_in - w_out + 1]
    for |w_in - w_out| <= 1, else 0.  The W-direction zero padding of the conv
    is implicit in the banded structure.
    """
    cout, cin = w_oihw.shape[0], w_oihw.shape[1]
    wk = jnp.transpose(w_oihw, (2, 3, 1, 0)).astype(jnp.float32)   # (kh, kw, c, p)
    shift = jnp.stack([jnp.eye(width, k=1 - kw, dtype=jnp.float32)
                       for kw in range(3)])                        # (3, W, W)
    bw = jnp.einsum('kuw,hkcp->hcupw', shift, wk)                  # (3, C, W, P, W)
    return bw.reshape(3, cin * width, cout * width)


def basic_block_forward(x_nchw, w1, g1, b1, w2, g2, b2):
    """x_nchw: (N, Cin, H, W); w*: (P, Cin, 3, 3) PyTorch OIHW; g*/b*: (P,)."""
    N, Cin, H, W = x_nchw.shape
    P = w1.shape[0]
    assert Cin == P, "identity-shortcut configuration requires in_planes == planes"
    L = P * W
    M = N * H
    count = float(N * H * W)

    # Layout glue: NCHW -> (N*H, C*W), lane index = c*W + w (lane-dense).
    x2d = jnp.transpose(x_nchw, (0, 2, 1, 3)).reshape(M, L).astype(jnp.float32)

    # bf16 banded weights: conv runs bf16 x bf16 -> f32 on the MXU.
    bw1 = _banded_conv_weight(w1, W).astype(jnp.bfloat16)          # (3, L, L)
    bw2 = _banded_conv_weight(w2, W).astype(jnp.bfloat16)          # (3, L, L)
    g1l = jnp.repeat(g1.astype(jnp.float32), W).reshape(1, L)
    b1l = jnp.repeat(b1.astype(jnp.float32), W).reshape(1, L)
    g2l = jnp.repeat(g2.astype(jnp.float32), W).reshape(1, L)
    b2l = jnp.repeat(b2.astype(jnp.float32), W).reshape(1, L)
    bmat = jnp.kron(jnp.eye(P, dtype=jnp.float32),
                    jnp.ones((W, W), jnp.float32)) / count          # (L, L)

    def fullspec(shape):
        n = len(shape)
        return pl.BlockSpec(shape, lambda i, _n=n: (0,) * _n)

    out2d = pl.pallas_call(
        functools.partial(_basic_block_kernel, N=N, H=H, W=W, P=P),
        out_shape=jax.ShapeDtypeStruct((M, L), jnp.float32),
        grid=(1,),
        in_specs=[fullspec(x2d.shape), fullspec(bw1.shape), fullspec(g1l.shape),
                  fullspec(b1l.shape), fullspec(bw2.shape), fullspec(g2l.shape),
                  fullspec(b2l.shape), fullspec(bmat.shape)],
        out_specs=fullspec((M, L)),
        compiler_params=pltpu.CompilerParams(
            dimension_semantics=("arbitrary",)),
    )(x2d, bw1, g1l, b1l, bw2, g2l, b2l, bmat)

    # (N*H, P*W) -> NCHW
    return jnp.transpose(out2d.reshape(N, H, P, W), (0, 2, 1, 3))


def ref_basic_block(x_nchw, w1, g1, b1, w2, g2, b2, conv_dtype=jnp.float32):
    """Pure-JAX reference (NCHW, PyTorch train-mode semantics).

    conv_dtype=bfloat16 reproduces the kernel's MXU input rounding exactly
    (f32 accumulation, f32 BN stats/affine, f32 residual).
    """
    dn = lax.conv_dimension_numbers(x_nchw.shape, w1.shape,
                                    ('NCHW', 'OIHW', 'NCHW'))

    def conv(a, w):
        return lax.conv_general_dilated(a.astype(conv_dtype), w.astype(conv_dtype),
                                        (1, 1), 'SAME', dimension_numbers=dn,
                                        preferred_element_type=jnp.float32)

    def bn(y, g, b):
        mean = jnp.mean(y, axis=(0, 2, 3), keepdims=True)
        var = jnp.mean(jnp.square(y - mean), axis=(0, 2, 3), keepdims=True)
        yhat = (y - mean) / jnp.sqrt(var + EPS)
        return yhat * g.reshape(1, -1, 1, 1) + b.reshape(1, -1, 1, 1)

    y = jax.nn.relu(bn(conv(x_nchw, w1), g1, b1))
    y = bn(conv(y, w2), g2, b2)
    return jax.nn.relu(y + x_nchw)


if __name__ == "__main__":
    N, C, H, W = 2, 8, 16, 16       # in_planes = planes = 8, stride = 1, C*W = 128
    key = jax.random.PRNGKey(0)
    k_x, k_w1, k_w2, k_g1, k_b1, k_g2, k_b2 = jax.random.split(key, 7)

    x = jax.random.normal(k_x, (N, C, H, W), dtype=jnp.float32)
    w1 = 0.1 * jax.random.normal(k_w1, (C, C, 3, 3), dtype=jnp.float32)
    w2 = 0.1 * jax.random.normal(k_w2, (C, C, 3, 3), dtype=jnp.float32)
    g1 = 1.0 + 0.05 * jax.random.normal(k_g1, (C,), dtype=jnp.float32)
    b1 = 0.05 * jax.random.normal(k_b1, (C,), dtype=jnp.float32)
    g2 = 1.0 + 0.05 * jax.random.normal(k_g2, (C,), dtype=jnp.float32)
    b2 = 0.05 * jax.random.normal(k_b2, (C,), dtype=jnp.float32)

    out = jax.block_until_ready(basic_block_forward(x, w1, g1, b1, w2, g2, b2))
    assert out.shape == (N, C, H, W)

    # Tight check against a reference with the same bf16 conv-input rounding.
    ref_bf = jax.block_until_ready(
        ref_basic_block(x, w1, g1, b1, w2, g2, b2, conv_dtype=jnp.bfloat16))
    err_bf = float(jnp.max(jnp.abs(out - ref_bf)))
    assert err_bf < 2e-3, f"mismatch vs bf16-matched reference: {err_bf}"

    # Looser check against the pure-f32 reference (module-level semantics;
    # the only deviation is bf16 rounding of the conv inputs/weights).
    ref_f32 = jax.block_until_ready(ref_basic_block(x, w1, g1, b1, w2, g2, b2))
    err_f32 = float(jnp.max(jnp.abs(out - ref_f32)))
    assert err_f32 < 1e-1, f"mismatch vs f32 reference: {err_f32}"

    print("KERNEL_OK")
</pallas_src>

<mosaic_0001>
module attributes {stable_mosaic.version = 11 : i64} {
  func.func @_basic_block_kernel(%arg0: i32, %arg1: memref<32x128xf32, #tpu.memory_space<vmem>>, %arg2: memref<3x128x128xbf16, #tpu.memory_space<vmem>>, %arg3: memref<1x128xf32, #tpu.memory_space<vmem>>, %arg4: memref<1x128xf32, #tpu.memory_space<vmem>>, %arg5: memref<3x128x128xbf16, #tpu.memory_space<vmem>>, %arg6: memref<1x128xf32, #tpu.memory_space<vmem>>, %arg7: memref<1x128xf32, #tpu.memory_space<vmem>>, %arg8: memref<128x128xf32, #tpu.memory_space<vmem>>, %arg9: memref<32x128xf32, #tpu.memory_space<vmem>>) attributes {dimension_semantics = [#tpu.dimension_semantics<arbitrary>], iteration_bounds = array<i64: 1>, scalar_prefetch = 0 : i64, scratch_operands = 0 : i64, tpu.core_type = #tpu.core_type<tc>, window_params = [{pipeline_mode = #tpu.pipeline_mode<synchronous>, transform_indices = @transform_0, window_bounds = array<i64: 32, 128>}, {pipeline_mode = #tpu.pipeline_mode<synchronous>, transform_indices = @transform_1, window_bounds = array<i64: 3, 128, 128>}, {pipeline_mode = #tpu.pipeline_mode<synchronous>, transform_indices = @transform_2, window_bounds = array<i64: 1, 128>}, {pipeline_mode = #tpu.pipeline_mode<synchronous>, transform_indices = @transform_3, window_bounds = array<i64: 1, 128>}, {pipeline_mode = #tpu.pipeline_mode<synchronous>, transform_indices = @transform_4, window_bounds = array<i64: 3, 128, 128>}, {pipeline_mode = #tpu.pipeline_mode<synchronous>, transform_indices = @transform_5, window_bounds = array<i64: 1, 128>}, {pipeline_mode = #tpu.pipeline_mode<synchronous>, transform_indices = @transform_6, window_bounds = array<i64: 1, 128>}, {pipeline_mode = #tpu.pipeline_mode<synchronous>, transform_indices = @transform_7, window_bounds = array<i64: 128, 128>}, {pipeline_mode = #tpu.pipeline_mode<synchronous>, transform_indices = @transform_8, window_bounds = array<i64: 32, 128>}]} {
    %0 = tpu.iota {dimensions = array<i32: 0>} : vector<32x128xi32>
    %c16_i32 = arith.constant 16 : i32
    %c0_i32 = arith.constant 0 : i32
    %1 = arith.cmpi eq, %c16_i32, %c0_i32 : i32
    %c1_i32 = arith.constant 1 : i32
    %2 = arith.select %1, %c1_i32, %c16_i32 : i32
    %3 = vector.broadcast %2 : i32 to vector<32x128xi32>
    %4 = arith.remsi %0, %3 : vector<32x128xi32>
    %c0_i32_0 = arith.constant 0 : i32
    %5 = vector.broadcast %c0_i32_0 : i32 to vector<32x128xi32>
    %6 = arith.cmpi ne, %4, %5 : vector<32x128xi32>
    %c0_i32_1 = arith.constant 0 : i32
    %7 = vector.broadcast %c0_i32_1 : i32 to vector<32x128xi32>
    %8 = arith.cmpi slt, %4, %7 : vector<32x128xi32>
    %c0_i32_2 = arith.constant 0 : i32
    %9 = arith.cmpi slt, %2, %c0_i32_2 : i32
    %10 = vector.broadcast %9 : i1 to vector<32x128xi1>
    %11 = vector.broadcast %10 : vector<32x128xi1> to vector<32x128xi1>
    %12 = arith.xori %8, %11 : vector<32x128xi1>
    %13 = arith.andi %12, %6 : vector<32x128xi1>
    %14 = vector.broadcast %2 : i32 to vector<32x128xi32>
    %15 = arith.addi %4, %14 : vector<32x128xi32>
    %16 = arith.select %13, %15, %4 : vector<32x128xi1>, vector<32x128xi32>
    %c0_i32_3 = arith.constant 0 : i32
    %17 = vector.broadcast %c0_i32_3 : i32 to vector<32x128xi32>
    %18 = arith.cmpi ne, %16, %17 : vector<32x128xi32>
    %c15_i32 = arith.constant 15 : i32
    %19 = vector.broadcast %c15_i32 : i32 to vector<32x128xi32>
    %20 = arith.cmpi ne, %16, %19 : vector<32x128xi32>
    %c0 = arith.constant 0 : index
    %c0_4 = arith.constant 0 : index
    %21 = vector.load %arg1[%c0, %c0_4] : memref<32x128xf32, #tpu.memory_space<vmem>>, vector<32x128xf32>
    %c1_i32_5 = arith.constant 1 : i32
    %22 = tpu.dynamic_rotate %21 by %c1_i32_5 dim 0 : vector<32x128xf32>, i32 -> vector<32x128xf32>
    %cst = arith.constant 0.000000e+00 : f32
    %23 = vector.broadcast %cst : f32 to vector<32x128xf32>
    %24 = arith.select %18, %22, %23 : vector<32x128xi1>, vector<32x128xf32>
    %c31_i32 = arith.constant 31 : i32
    %25 = tpu.dynamic_rotate %21 by %c31_i32 dim 0 : vector<32x128xf32>, i32 -> vector<32x128xf32>
    %cst_6 = arith.constant 0.000000e+00 : f32
    %26 = vector.broadcast %cst_6 : f32 to vector<32x128xf32>
    %27 = arith.select %20, %25, %26 : vector<32x128xi1>, vector<32x128xf32>
    %28 = arith.truncf %21 : vector<32x128xf32> to vector<32x128xbf16>
    %c1 = arith.constant 1 : index
    %c0_7 = arith.constant 0 : index
    %c0_8 = arith.constant 0 : index
    %29 = vector.load %arg2[%c1, %c0_7, %c0_8] : memref<3x128x128xbf16, #tpu.memory_space<vmem>>, vector<1x128x128xbf16>
    %30 = vector.shape_cast %29 : vector<1x128x128xbf16> to vector<128x128xbf16>
    %cst_9 = arith.constant dense<0.000000e+00> : vector<32x128xf32>
    %31 = tpu.matmul %28, %30, %cst_9 {dimension_numbers = #tpu.dot_dimension_numbers<[1], [0], [0], [1], [0, 0, 1, 1], [], []>} : vector<32x128xbf16>, vector<128x128xbf16>, vector<32x128xf32> -> vector<32x128xf32>
    %32 = arith.truncf %24 : vector<32x128xf32> to vector<32x128xbf16>
    %c0_10 = arith.constant 0 : index
    %c0_11 = arith.constant 0 : index
    %c0_12 = arith.constant 0 : index
    %33 = vector.load %arg2[%c0_10, %c0_11, %c0_12] : memref<3x128x128xbf16, #tpu.memory_space<vmem>>, vector<1x128x128xbf16>
    %34 = vector.shape_cast %33 : vector<1x128x128xbf16> to vector<128x128xbf16>
    %cst_13 = arith.constant dense<0.000000e+00> : vector<32x128xf32>
    %35 = tpu.matmul %32, %34, %cst_13 {dimension_numbers = #tpu.dot_dimension_numbers<[1], [0], [0], [1], [0, 0, 1, 1], [], []>} : vector<32x128xbf16>, vector<128x128xbf16>, vector<32x128xf32> -> vector<32x128xf32>
    %36 = arith.addf %31, %35 : vector<32x128xf32>
    %37 = arith.truncf %27 : vector<32x128xf32> to vector<32x128xbf16>
    %c2 = arith.constant 2 : index
    %c0_14 = arith.constant 0 : index
    %c0_15 = arith.constant 0 : index
    %38 = vector.load %arg2[%c2, %c0_14, %c0_15] : memref<3x128x128xbf16, #tpu.memory_space<vmem>>, vector<1x128x128xbf16>
    %39 = vector.shape_cast %38 : vector<1x128x128xbf16> to vector<128x128xbf16>
    %cst_16 = arith.constant dense<0.000000e+00> : vector<32x128xf32>
    %40 = tpu.matmul %37, %39, %cst_16 {dimension_numbers = #tpu.dot_dimension_numbers<[1], [0], [0], [1], [0, 0, 1, 1], [], []>} : vector<32x128xbf16>, vector<128x128xbf16>, vector<32x128xf32> -> vector<32x128xf32>
    %41 = arith.addf %36, %40 : vector<32x128xf32>
    %cst_17 = arith.constant dense<0.000000e+00> : vector<128xf32>
    %42 = vector.multi_reduction <add>, %41, %cst_17 [0] : vector<32x128xf32> to vector<128xf32>
    %43 = vector.shape_cast %42 : vector<128xf32> to vector<1x128xf32>
    %44 = arith.mulf %41, %41 : vector<32x128xf32>
    %cst_18 = arith.constant dense<0.000000e+00> : vector<128xf32>
    %45 = vector.multi_reduction <add>, %44, %cst_18 [0] : vector<32x128xf32> to vector<128xf32>
    %46 = vector.shape_cast %45 : vector<128xf32> to vector<1x128xf32>
    %47 = tpu.concatenate %43, %46 in 0 : vector<1x128xf32>, vector<1x128xf32> -> vector<2x128xf32>
    %c0_19 = arith.constant 0 : index
    %c0_20 = arith.constant 0 : index
    %48 = vector.load %arg8[%c0_19, %c0_20] : memref<128x128xf32, #tpu.memory_space<vmem>>, vector<128x128xf32>
    %cst_21 = arith.constant dense<0.000000e+00> : vector<2x128xf32>
    %49 = tpu.matmul %47, %48, %cst_21 {dimension_numbers = #tpu.dot_dimension_numbers<[1], [0], [0], [1], [0, 0, 1, 1], [], []>} : vector<2x128xf32>, vector<128x128xf32>, vector<2x128xf32> -> vector<2x128xf32>
    %50 = vector.extract_strided_slice %49 {offsets = [0, 0], sizes = [1, 128], strides = [1, 1]} : vector<2x128xf32> to vector<1x128xf32>
    %51 = vector.extract_strided_slice %49 {offsets = [1, 0], sizes = [1, 128], strides = [1, 1]} : vector<2x128xf32> to vector<1x128xf32>
    %52 = arith.mulf %50, %50 : vector<1x128xf32>
    %53 = arith.subf %51, %52 : vector<1x128xf32>
    %c0_22 = arith.constant 0 : index
    %c0_23 = arith.constant 0 : index
    %54 = vector.load %arg3[%c0_22, %c0_23] : memref<1x128xf32, #tpu.memory_space<vmem>>, vector<1x128xf32>
    %cst_24 = arith.constant 9.99999974E-6 : f32
    %55 = vector.broadcast %cst_24 : f32 to vector<1x128xf32>
    %56 = arith.addf %53, %55 : vector<1x128xf32>
    %57 = math.rsqrt %56 : vector<1x128xf32>
    %58 = arith.mulf %54, %57 : vector<1x128xf32>
    %c0_25 = arith.constant 0 : index
    %c0_26 = arith.constant 0 : index
    %59 = vector.load %arg4[%c0_25, %c0_26] : memref<1x128xf32, #tpu.memory_space<vmem>>, vector<1x128xf32>
    %60 = arith.mulf %50, %58 : vector<1x128xf32>
    %61 = arith.subf %59, %60 : vector<1x128xf32>
    %62 = vector.broadcast %58 : vector<1x128xf32> to vector<32x128xf32>
    %63 = arith.mulf %41, %62 : vector<32x128xf32>
    %64 = vector.broadcast %61 : vector<1x128xf32> to vector<32x128xf32>
    %65 = arith.addf %63, %64 : vector<32x128xf32>
    %cst_27 = arith.constant 0.000000e+00 : f32
    %66 = vector.broadcast %cst_27 : f32 to vector<32x128xf32>
    %67 = arith.maximumf %65, %66 : vector<32x128xf32>
    %c1_i32_28 = arith.constant 1 : i32
    %68 = tpu.dynamic_rotate %67 by %c1_i32_28 dim 0 : vector<32x128xf32>, i32 -> vector<32x128xf32>
    %cst_29 = arith.constant 0.000000e+00 : f32
    %69 = vector.broadcast %cst_29 : f32 to vector<32x128xf32>
    %70 = arith.select %18, %68, %69 : vector<32x128xi1>, vector<32x128xf32>
    %c31_i32_30 = arith.constant 31 : i32
    %71 = tpu.dynamic_rotate %67 by %c31_i32_30 dim 0 : vector<32x128xf32>, i32 -> vector<32x128xf32>
    %cst_31 = arith.constant 0.000000e+00 : f32
    %72 = vector.broadcast %cst_31 : f32 to vector<32x128xf32>
    %73 = arith.select %20, %71, %72 : vector<32x128xi1>, vector<32x128xf32>
    %74 = arith.truncf %67 : vector<32x128xf32> to vector<32x128xbf16>
    %c1_32 = arith.constant 1 : index
    %c0_33 = arith.constant 0 : index
    %c0_34 = arith.constant 0 : index
    %75 = vector.load %arg5[%c1_32, %c0_33, %c0_34] : memref<3x128x128xbf16, #tpu.memory_space<vmem>>, vector<1x128x128xbf16>
    %76 = vector.shape_cast %75 : vector<1x128x128xbf16> to vector<128x128xbf16>
    %cst_35 = arith.constant dense<0.000000e+00> : vector<32x128xf32>
    %77 = tpu.matmul %74, %76, %cst_35 {dimension_numbers = #tpu.dot_dimension_numbers<[1], [0], [0], [1], [0, 0, 1, 1], [], []>} : vector<32x128xbf16>, vector<128x128xbf16>, vector<32x128xf32> -> vector<32x128xf32>
    %78 = arith.truncf %70 : vector<32x128xf32> to vector<32x128xbf16>
    %c0_36 = arith.constant 0 : index
    %c0_37 = arith.constant 0 : index
    %c0_38 = arith.constant 0 : index
    %79 = vector.load %arg5[%c0_36, %c0_37, %c0_38] : memref<3x128x128xbf16, #tpu.memory_space<vmem>>, vector<1x128x128xbf16>
    %80 = vector.shape_cast %79 : vector<1x128x128xbf16> to vector<128x128xbf16>
    %cst_39 = arith.constant dense<0.000000e+00> : vector<32x128xf32>
    %81 = tpu.matmul %78, %80, %cst_39 {dimension_numbers = #tpu.dot_dimension_numbers<[1], [0], [0], [1], [0, 0, 1, 1], [], []>} : vector<32x128xbf16>, vector<128x128xbf16>, vector<32x128xf32> -> vector<32x128xf32>
    %82 = arith.addf %77, %81 : vector<32x128xf32>
    %83 = arith.truncf %73 : vector<32x128xf32> to vector<32x128xbf16>
    %c2_40 = arith.constant 2 : index
    %c0_41 = arith.constant 0 : index
    %c0_42 = arith.constant 0 : index
    %84 = vector.load %arg5[%c2_40, %c0_41, %c0_42] : memref<3x128x128xbf16, #tpu.memory_space<vmem>>, vector<1x128x128xbf16>
    %85 = vector.shape_cast %84 : vector<1x128x128xbf16> to vector<128x128xbf16>
    %cst_43 = arith.constant dense<0.000000e+00> : vector<32x128xf32>
    %86 = tpu.matmul %83, %85, %cst_43 {dimension_numbers = #tpu.dot_dimension_numbers<[1], [0], [0], [1], [0, 0, 1, 1], [], []>} : vector<32x128xbf16>, vector<128x128xbf16>, vector<32x128xf32> -> vector<32x128xf32>
    %87 = arith.addf %82, %86 : vector<32x128xf32>
    %cst_44 = arith.constant dense<0.000000e+00> : vector<128xf32>
    %88 = vector.multi_reduction <add>, %87, %cst_44 [0] : vector<32x128xf32> to vector<128xf32>
    %89 = vector.shape_cast %88 : vector<128xf32> to vector<1x128xf32>
    %90 = arith.mulf %87, %87 : vector<32x128xf32>
    %cst_45 = arith.constant dense<0.000000e+00> : vector<128xf32>
    %91 = vector.multi_reduction <add>, %90, %cst_45 [0] : vector<32x128xf32> to vector<128xf32>
    %92 = vector.shape_cast %91 : vector<128xf32> to vector<1x128xf32>
    %93 = tpu.concatenate %89, %92 in 0 : vector<1x128xf32>, vector<1x128xf32> -> vector<2x128xf32>
    %c0_46 = arith.constant 0 : index
    %c0_47 = arith.constant 0 : index
    %94 = vector.load %arg8[%c0_46, %c0_47] : memref<128x128xf32, #tpu.memory_space<vmem>>, vector<128x128xf32>
    %cst_48 = arith.constant dense<0.000000e+00> : vector<2x128xf32>
    %95 = tpu.matmul %93, %94, %cst_48 {dimension_numbers = #tpu.dot_dimension_numbers<[1], [0], [0], [1], [0, 0, 1, 1], [], []>} : vector<2x128xf32>, vector<128x128xf32>, vector<2x128xf32> -> vector<2x128xf32>
    %96 = vector.extract_strided_slice %95 {offsets = [0, 0], sizes = [1, 128], strides = [1, 1]} : vector<2x128xf32> to vector<1x128xf32>
    %97 = vector.extract_strided_slice %95 {offsets = [1, 0], sizes = [1, 128], strides = [1, 1]} : vector<2x128xf32> to vector<1x128xf32>
    %98 = arith.mulf %96, %96 : vector<1x128xf32>
    %99 = arith.subf %97, %98 : vector<1x128xf32>
    %c0_49 = arith.constant 0 : index
    %c0_50 = arith.constant 0 : index
    %100 = vector.load %arg6[%c0_49, %c0_50] : memref<1x128xf32, #tpu.memory_space<vmem>>, vector<1x128xf32>
    %cst_51 = arith.constant 9.99999974E-6 : f32
    %101 = vector.broadcast %cst_51 : f32 to vector<1x128xf32>
    %102 = arith.addf %99, %101 : vector<1x128xf32>
    %103 = math.rsqrt %102 : vector<1x128xf32>
    %104 = arith.mulf %100, %103 : vector<1x128xf32>
    %c0_52 = arith.constant 0 : index
    %c0_53 = arith.constant 0 : index
    %105 = vector.load %arg7[%c0_52, %c0_53] : memref<1x128xf32, #tpu.memory_space<vmem>>, vector<1x128xf32>
    %106 = arith.mulf %96, %104 : vector<1x128xf32>
    %107 = arith.subf %105, %106 : vector<1x128xf32>
    %108 = vector.broadcast %104 : vector<1x128xf32> to vector<32x128xf32>
    %109 = arith.mulf %87, %108 : vector<32x128xf32>
    %110 = vector.broadcast %107 : vector<1x128xf32> to vector<32x128xf32>
    %111 = arith.addf %109, %110 : vector<32x128xf32>
    %112 = arith.addf %111, %21 : vector<32x128xf32>
    %cst_54 = arith.constant 0.000000e+00 : f32
    %113 = vector.broadcast %cst_54 : f32 to vector<32x128xf32>
    %114 = arith.maximumf %112, %113 : vector<32x128xf32>
    %c0_55 = arith.constant 0 : index
    %c0_56 = arith.constant 0 : index
    %115 = vector.load %arg9[%c0_55, %c0_56] : memref<32x128xf32, #tpu.memory_space<vmem>>, vector<32x128xf32>
    tpu.vector_store %arg9[%c0_55, %c0_56], %114 {strides = array<i32>} : memref<32x128xf32, #tpu.memory_space<vmem>>, vector<32x128xf32>,
    return
  }
  func.func @transform_0(%arg0: i32) -> (i32, i32) {
    %c0_i32 = arith.constant 0 : i32
    %c0_i32_0 = arith.constant 0 : i32
    %c0_i32_1 = arith.constant 0 : i32
    return %c0_i32, %c0_i32_0 : i32, i32
  }
  func.func @transform_1(%arg0: i32) -> (i32, i32, i32) {
    %c0_i32 = arith.constant 0 : i32
    %c0_i32_0 = arith.constant 0 : i32
    %c0_i32_1 = arith.constant 0 : i32
    %c0_i32_2 = arith.constant 0 : i32
    return %c0_i32, %c0_i32_0, %c0_i32_1 : i32, i32, i32
  }
  func.func @transform_2(%arg0: i32) -> (i32, i32) {
    %c0_i32 = arith.constant 0 : i32
    %c0_i32_0 = arith.constant 0 : i32
    %c0_i32_1 = arith.constant 0 : i32
    return %c0_i32, %c0_i32_0 : i32, i32
  }
  func.func @transform_3(%arg0: i32) -> (i32, i32) {
    %c0_i32 = arith.constant 0 : i32
    %c0_i32_0 = arith.constant 0 : i32
    %c0_i32_1 = arith.constant 0 : i32
    return %c0_i32, %c0_i32_0 : i32, i32
  }
  func.func @transform_4(%arg0: i32) -> (i32, i32, i32) {
    %c0_i32 = arith.constant 0 : i32
    %c0_i32_0 = arith.constant 0 : i32
    %c0_i32_1 = arith.constant 0 : i32
    %c0_i32_2 = arith.constant 0 : i32
    return %c0_i32, %c0_i32_0, %c0_i32_1 : i32, i32, i32
  }
  func.func @transform_5(%arg0: i32) -> (i32, i32) {
    %c0_i32 = arith.constant 0 : i32
    %c0_i32_0 = arith.constant 0 : i32
    %c0_i32_1 = arith.constant 0 : i32
    return %c0_i32, %c0_i32_0 : i32, i32
  }
  func.func @transform_6(%arg0: i32) -> (i32, i32) {
    %c0_i32 = arith.constant 0 : i32
    %c0_i32_0 = arith.constant 0 : i32
    %c0_i32_1 = arith.constant 0 : i32
    return %c0_i32, %c0_i32_0 : i32, i32
  }
  func.func @transform_7(%arg0: i32) -> (i32, i32) {
    %c0_i32 = arith.constant 0 : i32
    %c0_i32_0 = arith.constant 0 : i32
    %c0_i32_1 = arith.constant 0 : i32
    return %c0_i32, %c0_i32_0 : i32, i32
  }
  func.func @transform_8(%arg0: i32) -> (i32, i32) {
    %c0_i32 = arith.constant 0 : i32
    %c0_i32_0 = arith.constant 0 : i32
    %c0_i32_1 = arith.constant 0 : i32
    return %c0_i32, %c0_i32_0 : i32, i32
  }
}

</mosaic_0001>

<bundles_post_ra>
// kernel: tpu_custom_call.1
= control target key start
LH: loop header
LB: loop body
LE: loop exit
PB: predicated region body
PF: predicated region fallthrough
CT: control target
= control target key end

     0   :  { %13 = vsyncpa [#allocation3], 0  ;;  %s2160_s0 = inlined_call_operand.hbm [shape: f32[32,128], index: 0, kind: input, shape index: {}]   ;;  %s2161_s1 = inlined_call_operand.hbm [shape: bf16[3,128,128], index: 1, kind: input, shape index: {}]   ;;  %s2162_s2 = inlined_call_operand.vmem [shape: f32[1,128], index: 2, kind: input, shape index: {}]   ;;  %s2163_s3 = inlined_call_operand.vmem [shape: f32[1,128], index: 3, kind: input, shape index: {}]   ;;  %s2164_s4 = inlined_call_operand.hbm [shape: bf16[3,128,128], index: 4, kind: input, shape index: {}]   ;;  %s2165_s5 = inlined_call_operand.vmem [shape: f32[1,128], index: 5, kind: input, shape index: {}]   ;;  %s2166_s6 = inlined_call_operand.vmem [shape: f32[1,128], index: 6, kind: input, shape index: {}]   ;;  %s2167_s7 = inlined_call_operand.hbm [shape: f32[128,128], index: 7, kind: input, shape index: {}]   ;;  %s2168_s8 = inlined_call_operand.hbm [shape: f32[32,128], index: 8, kind: output, shape index: {}]  }
   0x1   :  { %14 = vsyncpa [#allocation6], 0 }
   0x2   :  { %15 = vsyncpa [#allocation9], 0 }
   0x3   :  { %16 = vsyncpa [#allocation4], 0  ;;  %s1843_s27 = smov [#allocation5]   ;;  %s1725_s9 = scalar_lea.hbm %s2161_s1, 3072 }
   0x4   :  { %s34_s28 = sshll.u32 %s1843_s27, 4  ;;  %p1726_p0 = scmp.ne.s32.totalorder %s2161_s1, %s1725_s9  ;;  %s35_s28 = int_to_ptr.vmem [resolvable:$true] %s34_s28 }
   0x5   :  { %p1729_p1 = scmp.lt.u32.totalorder %s1725_s9, %s2161_s1 }
   0x7   :  { %p1731_p2 = pnand %p1729_p1, %p1726_p0 }
   0x9   :  { %1734 = shalt.err (!%p1731_p2)
}
   0xa   :  { %s1735_s14 = scalar_lea.vmem %s35_s28, 3072  ;;  %p1740_p4 = scmp.lt.s32.totalorder %s35_s28, %s35_s28 }
   0xb   :  { %p1736_p3 = scmp.ne.s32.totalorder %s35_s28, %s1735_s14  ;;  %p1741_p5 = scmp.lt.s32.totalorder %s1735_s14, %s1735_s14 }
   0xd   :  { %p1742_p6 = por %p1741_p5, %p1740_p4 }
   0xf   :  { %p1743_p7 = pnand %p1742_p6, %p1736_p3 }
  0x11   :  { %1746 = shalt.err (!%p1743_p7)
}
  0x12   :  { %s1844_s15 = smov 64   ;;  %s1845_s16 = smov 4  }
  0x13   :  { %40 = dma.hbm_to_vmem [thread:$0]  %s2161_s1, 3072, %s35_s28, [#allocation6], %s1844_s15, %s1844_s15, %s1845_s16  }
  0x14   :  { %s1846_s19 = smov [#allocation2]   ;;  %s1747_s23 = scalar_lea.hbm %s2160_s0, 512 }
  0x15   :  { %s22_s20 = sshll.u32 %s1846_s19, 4  ;;  %p1748_p8 = scmp.ne.s32.totalorder %s2160_s0, %s1747_s23  ;;  %s23_s20 = int_to_ptr.vmem [resolvable:$true] %s22_s20 }
  0x16   :  { %p1751_p9 = scmp.lt.u32.totalorder %s1747_s23, %s2160_s0 }
  0x18   :  { %p1753_p10 = pnand %p1751_p9, %p1748_p8 }
  0x1a   :  { %1756 = shalt.err (!%p1753_p10)
}
  0x1b   :  { %s1757_s29 = scalar_lea.vmem %s23_s20, 512  ;;  %p1762_p12 = scmp.lt.s32.totalorder %s23_s20, %s23_s20 }
  0x1c   :  { %p1758_p11 = scmp.ne.s32.totalorder %s23_s20, %s1757_s29  ;;  %p1763_p13 = scmp.lt.s32.totalorder %s1757_s29, %s1757_s29 }
  0x1e   :  { %p1764_p0 = por %p1763_p13, %p1762_p12 }
  0x20   :  { %p1765_p1 = pnand %p1764_p0, %p1758_p11 }
  0x22   :  { %1768 = shalt.err (!%p1765_p1)
}
  0x23   :  { %s1847_s1 = smov 128   ;;  %s1848_s28 = smov 8  }
  0x24   :  { %28 = dma.hbm_to_vmem [thread:$0]  %s2160_s0, 512, %s23_s20, [#allocation3], %s1847_s1, %s1847_s1, %s1848_s28  }
  0x25   :  { %s1849_s10 = smov [#allocation7]   ;;  %s1850_s12 = smov [#allocation8]  }
  0x26   :  { %s50_s11 = sshll.u32 %s1849_s10, 4  ;;  %s66_s13 = sshll.u32 %s1850_s12, 4  ;;  %s51_s11 = int_to_ptr.vmem [resolvable:$true] %s50_s11  ;;  %s1932_s13 = int_to_ptr.vmem [resolvable:$true] %s66_s13 }
  0x27   :  { %s1769_s18 = scalar_lea.hbm %s2164_s4, 3072 }
  0x28   :  { %p1770_p2 = scmp.ne.s32.totalorder %s2164_s4, %s1769_s18  ;;  %p1773_p3 = scmp.lt.u32.totalorder %s1769_s18, %s2164_s4 }
  0x2a   :  { %p1775_p4 = pnand %p1773_p3, %p1770_p2 }
  0x2c   :  { %1778 = shalt.err (!%p1775_p4)
}
  0x2d   :  { %s1779_s0 = scalar_lea.vmem %s51_s11, 3072  ;;  %p1784_p6 = scmp.lt.s32.totalorder %s51_s11, %s51_s11 }
  0x2e   :  { %p1780_p5 = scmp.ne.s32.totalorder %s51_s11, %s1779_s0  ;;  %p1785_p7 = scmp.lt.s32.totalorder %s1779_s0, %s1779_s0 }
  0x30   :  { %p1786_p8 = por %p1785_p7, %p1784_p6 }
  0x32   :  { %p1787_p9 = pnand %p1786_p8, %p1780_p5 }
  0x34   :  { %1790 = shalt.err (!%p1787_p9)
}
  0x35   :  { %56 = dma.hbm_to_vmem [thread:$0]  %s2164_s4, 3072, %s51_s11, [#allocation6], %s1844_s15, %s1844_s15, %s1845_s16  }
  0x36   :  { %s1791_s27 = scalar_lea.hbm %s2167_s7, 2048 }
  0x37   :  { %p1792_p10 = scmp.ne.s32.totalorder %s2167_s7, %s1791_s27  ;;  %p1795_p11 = scmp.lt.u32.totalorder %s1791_s27, %s2167_s7 }
  0x39   :  { %p1797_p12 = pnand %p1795_p11, %p1792_p10 }
  0x3b   :  { %1800 = shalt.err (!%p1797_p12)
}
  0x3c   :  { %s1801_s12 = scalar_lea.vmem %s1932_s13, 2048  ;;  %p1806_p0 = scmp.lt.s32.totalorder %s1932_s13, %s1932_s13 }
  0x3d   :  { %p1802_p13 = scmp.ne.s32.totalorder %s1932_s13, %s1801_s12  ;;  %p1807_p1 = scmp.lt.s32.totalorder %s1801_s12, %s1801_s12 }
  0x3f   :  { %p1808_p2 = por %p1807_p1, %p1806_p0 }
  0x41   :  { %p1809_p3 = pnand %p1808_p2, %p1802_p13 }
  0x43   :  { %1812 = shalt.err (!%p1809_p3)
}
  0x44   :  { %72 = dma.hbm_to_vmem [thread:$0]  %s2167_s7, 2048, %s1932_s13, [#allocation9], %s1847_s1, %s1847_s1, %s1848_s28  }
  0x45   :  { %1835 = dma.done.wait [#allocation3], 512  }
  0x46   :  { %1836 = vsyncadd [#allocation3], 4294966784 }
  0x47   :  { %1837 = dma.done.wait [#allocation6], 6144  }
  0x48   :  { %1838 = vsyncadd [#allocation6], 4294961152 }
  0x49   :  { %1839 = dma.done.wait [#allocation9], 2048  }
  0x4a   :  { %1840 = vsyncadd [#allocation9], 4294965248  ;;  %v1851_v0 = vmov 0.0|0.0   ;;  %v86_v1 = vlaneseq  ;;  %v1673_v2 = vld [vmem:[#allocation5] sm:$0xff]   ;;  %v1674_v4 = vld [vmem:[#allocation5 + $0x8] sm:$0xff]   ;;  %vm1852_vm2 = vmmov 1  }
  0x4b   :  { %1595 = vmatprep.subr.bf16.mxu1 %v1851_v0  ;;  %1405 = vmatprep.subr.bf16.mxu0 %v1673_v2  ;;  %v1675_v5 = vld [vmem:[#allocation5 + $0x10] sm:$0xff]   ;;  %v1676_v7 = vld [vmem:[#allocation5 + $0x18] sm:$0xff]   ;;  %v1973_v8 = vld [vmem:[#allocation2] sm:$0xff]  ;;  %vm1853_vm11 = vmmov 0   ;;  %vm550_vm12 = vcmask 1040384  }
  0x4c   :  { %v1970_v3 = vshrl.u32 %v86_v1, 7  ;;  %1406 = vmatpush3.bf16.msra.mxu0 %v1673_v2  ;;  %v1975_v9 = vld [vmem:[#allocation2 + $0x8] sm:$0xff]  ;;  %v1977_v10 = vld [vmem:[#allocation2 + $0x18] sm:$0xff]  ;;  %v151_v11 = vrot.slane %v1973_v8, 7  ;;  %v1677_v17 = vld [vmem:[#allocation5 + $0x20] sm:$0xff]   ;;  %v164_v46 = vrot.slane %v1973_v8, 1 }
  0x4d   :  { %1407 = vmatprep.subr.bf16.mxu0 %v1674_v4  ;;  %v152_v12 = vrot.slane %v1975_v9, 7  ;;  %v154_v13 = vrot.slane %v1977_v10, 7  ;;  %v1678_v19 = vld [vmem:[#allocation5 + $0x28] sm:$0xff]   ;;  %v1679_v21 = vld [vmem:[#allocation5 + $0x30] sm:$0xff]   ;;  %v1680_v25 = vld [vmem:[#allocation5 + $0x38] sm:$0xff]   ;;  %v177_v38 = vpack.c.bf16 %v1975_v9, %v1973_v8  ;;  %v165_v47 = vrot.slane %v1975_v9, 1 }
  0x4e   :  { %v95_v6 = vand.u32 15, %v1970_v3  ;;  %vm155_vm1 = vcmp.lt.s32.totalorder %v1970_v3, 1  ;;  %v89_v20 = vadd.s32 16, %v1970_v3  ;;  %v1995_v23 = vld [vmem:[#allocation2 + $0x10] sm:$0xff]  ;;  %v1681_v26 = vld [vmem:[#allocation5 + $0x40] sm:$0xff]   ;;  %v553_v31 = vld [vmem:[#allocation8 + $0x8] sm:$0xff] }
  0x4f   :  { %v158_v14 = vsel %vm155_vm1, %v151_v11, %v152_v12  ;;  %v159_v15 = vsel %vm155_vm1, %v154_v13, %v151_v11  ;;  %v153_v24 = vrot.slane %v1995_v23, 7  ;;  %v552_v27 = vld [vmem:[#allocation8] sm:$0xff]  ;;  %v554_v32 = vld [vmem:[#allocation8 + $0x10] sm:$0xff]  ;;  %v555_v34 = vld [vmem:[#allocation8 + $0x18] sm:$0xff]  ;;  %v88_v44 = vadd.s32 8, %v1970_v3 }
  0x50   :  { %1408 = vmatpush3.bf16.msra.mxu0 %v1674_v4  ;;  %vm139_vm0 = vcmp.ne.s32.totalorder %v95_v6, 0  ;;  %v1248_v18 = vpack.c.bf16 %v158_v14, %v159_v15  ;;  %v109_v22 = vand.u32 15, %v89_v20  ;;  %v2007_v33 = vpack.c.bf16 %v553_v31, %v552_v27  ;;  %v1682_v36 = vld [vmem:[#allocation5 + $0x48] sm:$0xff]   ;;  %v1683_v39 = vld [vmem:[#allocation5 + $0x50] sm:$0xff]   ;;  %v1684_v40 = vld [vmem:[#allocation5 + $0x58] sm:$0xff]  }
  0x51   :  { %1409 = vmatprep.subr.bf16.mxu0 %v1675_v5  ;;  %vm1988_vm3 = vmpackc.low %vm1852_vm2, %vm139_vm0  ;;  %v156_v28 = vsel %vm155_vm1, %v153_v24, %v154_v13  ;;  %v157_v29 = vsel %vm155_vm1, %v152_v12, %v153_v24  ;;  %v2010_v37 = vpack.c.bf16 %v555_v34, %v554_v32  ;;  %v1685_v41 = vld [vmem:[#allocation5 + $0x60] sm:$0xff]   ;;  %v1686_v42 = vld [vmem:[#allocation5 + $0x68] sm:$0xff]   ;;  %v166_v48 = vrot.slane %v1995_v23, 1 }
  0x52   :  { %1421 = vmatprep.mubr.msk.bf16.mxu0 %vm1988_vm3, %v1248_v18  ;;  %vm141_vm4 = vcmp.ne.s32.totalorder %v109_v22, 0  ;;  %v1251_v35 = vpack.c.bf16 %v156_v28, %v157_v29  ;;  %1597 = vmatpush3.bf16.msra.mxu1 %v2007_v33  ;;  %v1687_v43 = vld [vmem:[#allocation5 + $0x70] sm:$0xff]   ;;  %v1688_v45 = vld [vmem:[#allocation5 + $0x78] sm:$0xff]   ;;  %v102_v49 = vand.u32 15, %v88_v44  ;;  %vm168_vm6 = vcmp.lt.s32.totalorder %v1970_v3, 7  ;;  %v1689_v50 = vld [vmem:[#allocation5 + $0x80] sm:$0xff]  }
  0x53   :  { %vm2003_vm5 = vmpackc.low %vm1852_vm2, %vm141_vm4  ;;  %1598 = vmatprep.subr.bf16.mxu1 %v1851_v0  ;;  %v170_v51 = vsel %vm168_vm6, %v165_v47, %v166_v48  ;;  %v171_v52 = vsel %vm168_vm6, %v164_v46, %v165_v47  ;;  %v178_v53 = vpack.c.bf16 %v1977_v10, %v1995_v23  ;;  %v1690_v55 = vld [vmem:[#allocation5 + $0x88] sm:$0xff]   ;;  %v1691_v57 = vld [vmem:[#allocation5 + $0x90] sm:$0xff]   ;;  %v90_v62 = vadd.s32 24, %v1970_v3 }
  0x54   :  { %1410 = vmatpush3.bf16.msra.mxu0 %v1675_v5  ;;  %vm144_vm7 = vcmp.ne.s32.totalorder %v102_v49, 15  ;;  %v1270_v54 = vpack.c.bf16 %v170_v51, %v171_v52  ;;  %v1692_v58 = vld [vmem:[#allocation5 + $0x98] sm:$0xff]   ;;  %v1693_v59 = vld [vmem:[#allocation5 + $0xa0] sm:$0xff]   ;;  %v1694_v60 = vld [vmem:[#allocation5 + $0xa8] sm:$0xff]   ;;  %v167_v63 = vrot.slane %v1977_v10, 1  ;;  %v1854_v27 = vmov 0.0  }
  0x55   :  { %1411 = vmatprep.subr.bf16.mxu0 %v1676_v7  ;;  %vm2031_vm8 = vmpackc.low %vm144_vm7, %vm1852_vm2  ;;  %v1695_v61 = vld [vmem:[#allocation5 + $0xb0] sm:$0xff]   ;;  %v1696_v1 = vld [vmem:[#allocation5 + $0xb8] sm:$0xff]   ;;  %v116_v2 = vand.u32 15, %v90_v62  ;;  %1497 = vmatprep.mubr.msk.f32.mxu1 %vm1853_vm11, %v1854_v27 }
  0x56   :  { %1600 = vmatpush3.bf16.msra.mxu1 %v2010_v37  ;;  %v169_v4 = vsel %vm168_vm6, %v166_v48, %v167_v63  ;;  %v172_v5 = vsel %vm168_vm6, %v167_v63, %v164_v46  ;;  %v556_v11 = vld [vmem:[#allocation8 + $0x20] sm:$0xff]  ;;  %v557_v12 = vld [vmem:[#allocation8 + $0x28] sm:$0xff]  ;;  %v558_v14 = vld [vmem:[#allocation8 + $0x30] sm:$0xff] }
  0x57   :  { %1601 = vmatprep.subr.bf16.mxu1 %v1851_v0  ;;  %vm146_vm9 = vcmp.ne.s32.totalorder %v116_v2, 15  ;;  %v1273_v6 = vpack.c.bf16 %v172_v5, %v169_v4  ;;  %v1602_v13 = vpack.c.bf16 %v557_v12, %v556_v11  ;;  %v559_v15 = vld [vmem:[#allocation8 + $0x38] sm:$0xff]  ;;  %v560_v18 = vld [vmem:[#allocation8 + $0x40] sm:$0xff]  ;;  %v566_v29 = vld [vmem:[#allocation8 + $0x70] sm:$0xff] }
  0x58   :  { %1412 = vmatpush3.bf16.msra.mxu0 %v1676_v7  ;;  %vm2044_vm10 = vmpackc.low %vm146_vm9, %vm1852_vm2  ;;  %v563_v22 = vld [vmem:[#allocation8 + $0x58] sm:$0xff]  ;;  %v1699_v62 = vld [vmem:[#allocation7 + $0x10] sm:$0xff]  }
  0x59   :  { %1413 = vmatprep.subr.bf16.mxu0 %v1677_v17  ;;  %v567_v31 = vld [vmem:[#allocation8 + $0x78] sm:$0xff]  ;;  %v1702_v2 = vld [vmem:[#allocation7 + $0x28] sm:$0xff]   ;;  %v1703_v4 = vld [vmem:[#allocation7 + $0x30] sm:$0xff]  }
  0x5a   :  { %1603 = vmatpush3.bf16.msra.mxu1 %v1602_v13  ;;  %v1617_v32 = vpack.c.bf16 %v567_v31, %v566_v29  ;;  %v1700_v63 = vld [vmem:[#allocation7 + $0x18] sm:$0xff]   ;;  %v664_v31 = vld [vmem:[%s2163_s3] sm:$0x1]  ;;  %v1710_v30 = vld [vmem:[#allocation7 + $0x68] sm:$0xff]  }
  0x5b   :  { %1604 = vmatprep.subr.bf16.mxu1 %v1851_v0  ;;  %v1704_v5 = vld [vmem:[#allocation7 + $0x38] sm:$0xff]  }
  0x5c   :  { %1414 = vmatpush3.bf16.msra.mxu0 %v1677_v17  ;;  %v1605_v17 = vpack.c.bf16 %v559_v15, %v558_v14  ;;  %v1708_v16 = vld [vmem:[#allocation7 + $0x58] sm:$0xff]  }
  0x5d   :  { %1415 = vmatprep.subr.bf16.mxu0 %v1678_v19 }
  0x5e   :  { %1606 = vmatpush3.bf16.msra.mxu1 %v1605_v17 }
  0x5f   :  { %1607 = vmatprep.subr.bf16.mxu1 %v1851_v0 }
  0x60   :  { %1416 = vmatpush3.bf16.msra.mxu0 %v1678_v19  ;;  %v561_v19 = vld [vmem:[#allocation8 + $0x48] sm:$0xff] }
  0x61   :  { %1417 = vmatprep.subr.bf16.mxu0 %v1679_v21  ;;  %v1608_v20 = vpack.c.bf16 %v561_v19, %v560_v18  ;;  %v1855_v18 = vmov 1966171168  }
  0x62   :  { %v648_v19 = vunpack.c.l.s4 %v1855_v18  ;;  %v1714_v18 = vld [vmem:[#allocation7 + $0x88] sm:$0xff]  }
  0x63   :  { %1609 = vmatpush3.bf16.msra.mxu1 %v1608_v20 }
  0x64   :  { %1418 = vmatpush3.bf16.msra.mxu0 %v1679_v21  ;;  %1610 = vmatprep.subr.bf16.mxu1 %v1851_v0  ;;  %v562_v21 = vld [vmem:[#allocation8 + $0x50] sm:$0xff] }
  0x65   :  { %1419 = vmatprep.subr.bf16.mxu0 %v1680_v25  ;;  %v1611_v24 = vpack.c.bf16 %v563_v22, %v562_v21 }
  0x67   :  { %1612 = vmatpush3.bf16.msra.mxu1 %v1611_v24 }
  0x68   :  { %1420 = vmatpush3.bf16.msra.mxu0 %v1680_v25  ;;  %v564_v25 = vld [vmem:[#allocation8 + $0x60] sm:$0xff]  ;;  %1613 = vmatprep.subr.bf16.mxu1 %v1851_v0 }
  0x69   :  { %1425 = vmatprep.subr.bf16.mxu0 %v1681_v26 }
  0x6b   :  { %1422 = vmatmul.mubr.msk.bf16.vlgmr.msra.gmra.mrb[0].mxu0 %vm2003_vm5, %v1251_v35 }
  0x6c   :  { %1426 = vmatpush3.bf16.msra.mxu0 %v1681_v26  ;;  %1441 = vmatprep.mubr.bf16.mxu0 %v177_v38  ;;  %v565_v26 = vld [vmem:[#allocation8 + $0x68] sm:$0xff] }
  0x6d   :  { %1427 = vmatprep.subr.bf16.mxu0 %v1682_v36  ;;  %v1614_v28 = vpack.c.bf16 %v565_v26, %v564_v25  ;;  %v643_v26 = vld [vmem:[%s2162_s2] sm:$0x1] }
  0x6f   :  { %1615 = vmatpush3.bf16.msra.mxu1 %v1614_v28 }
  0x70   :  { %1428 = vmatpush3.bf16.msra.mxu0 %v1682_v36  ;;  %1616 = vmatprep.subr.bf16.mxu1 %v1851_v0 }
  0x71   :  { %1429 = vmatprep.subr.bf16.mxu0 %v1683_v39 }
  0x73   :  { %1618 = vmatpush3.bf16.msra.mxu1 %v1617_v32 }
  0x74   :  { %1430 = vmatpush3.bf16.msra.mxu0 %v1683_v39 }
  0x75   :  { %1431 = vmatprep.subr.bf16.mxu0 %v1684_v40 }
  0x78   :  { %1432 = vmatpush3.bf16.msra.mxu0 %v1684_v40 }
  0x79   :  { %1433 = vmatprep.subr.bf16.mxu0 %v1685_v41 }
  0x7c   :  { %1434 = vmatpush3.bf16.msra.mxu0 %v1685_v41 }
  0x7d   :  { %1435 = vmatprep.subr.bf16.mxu0 %v1686_v42 }
  0x80   :  { %1436 = vmatpush3.bf16.msra.mxu0 %v1686_v42 }
  0x81   :  { %1437 = vmatprep.subr.bf16.mxu0 %v1687_v43 }
  0x84   :  { %1438 = vmatpush3.bf16.msra.mxu0 %v1687_v43 }
  0x85   :  { %1439 = vmatprep.subr.bf16.mxu0 %v1688_v45 }
  0x88   :  { %1440 = vmatpush3.bf16.msra.mxu0 %v1688_v45 }
  0x89   :  { %1445 = vmatprep.subr.bf16.mxu0 %v1689_v50 }
  0x8b   :  { %1442 = vmatmul.mubr.bf16.vlgmr.msra.gmra.mrb[0].mxu0 %v178_v53 }
  0x8c   :  { %1446 = vmatpush3.bf16.msra.mxu0 %v1689_v50  ;;  %1461 = vmatprep.mubr.msk.bf16.mxu0 %vm2031_vm8, %v1270_v54 }
  0x8d   :  { %1447 = vmatprep.subr.bf16.mxu0 %v1690_v55 }
  0x90   :  { %1448 = vmatpush3.bf16.msra.mxu0 %v1690_v55 }
  0x91   :  { %1449 = vmatprep.subr.bf16.mxu0 %v1691_v57 }
  0x94   :  { %1450 = vmatpush3.bf16.msra.mxu0 %v1691_v57 }
  0x95   :  { %1451 = vmatprep.subr.bf16.mxu0 %v1692_v58 }
  0x98   :  { %1452 = vmatpush3.bf16.msra.mxu0 %v1692_v58 }
  0x99   :  { %1453 = vmatprep.subr.bf16.mxu0 %v1693_v59 }
  0x9c   :  { %1454 = vmatpush3.bf16.msra.mxu0 %v1693_v59 }
  0x9d   :  { %1455 = vmatprep.subr.bf16.mxu0 %v1694_v60 }
  0xa0   :  { %1456 = vmatpush3.bf16.msra.mxu0 %v1694_v60  ;;  %v1697_v60 = vld [vmem:[#allocation7] sm:$0xff]  }
  0xa1   :  { %1457 = vmatprep.subr.bf16.mxu0 %v1695_v61  ;;  %1500 = vmatprep.subr.bf16.mxu1 %v1697_v60 }
  0xa4   :  { %1458 = vmatpush3.bf16.msra.mxu0 %v1695_v61  ;;  %v1698_v61 = vld [vmem:[#allocation7 + $0x8] sm:$0xff]  }
  0xa5   :  { %1459 = vmatprep.subr.bf16.mxu0 %v1696_v1 }
  0xa8   :  { %1460 = vmatpush3.bf16.msra.mxu0 %v1696_v1  ;;  %v1701_v1 = vld [vmem:[#allocation7 + $0x20] sm:$0xff]  }
  0xa9   :  { %1619 = vmatprep.subr.bf16.mxu0 %v1851_v0 }
  0xab   :  { %1462 = vmatmul.mubr.msk.bf16.vlgmr.msra.gmra.mrb[0].mxu0 %vm2044_vm10, %v1273_v6  ;;  %v1705_v6 = vld [vmem:[#allocation7 + $0x40] sm:$0xff]  }
  0xac   :  { %1621 = vmatpush3.bf16.msra.mxu0 %v2007_v33  ;;  %1592 = vmatprep.mubr.msk.f32.mxu0 %vm1853_vm11, %v1854_v27 }
  0xad   :  { %1622 = vmatprep.subr.bf16.mxu0 %v1851_v0 }
  0xb0   :  { %1624 = vmatpush3.bf16.msra.mxu0 %v2010_v37 }
  0xb1   :  { %1625 = vmatprep.subr.bf16.mxu0 %v1851_v0 }
  0xb4   :  { %1627 = vmatpush3.bf16.msra.mxu0 %v1602_v13 }
  0xb5   :  { %1628 = vmatprep.subr.bf16.mxu0 %v1851_v0 }
  0xb8   :  { %1630 = vmatpush3.bf16.msra.mxu0 %v1605_v17 }
  0xb9   :  { %1631 = vmatprep.subr.bf16.mxu0 %v1851_v0 }
  0xbc   :  { %1633 = vmatpush3.bf16.msra.mxu0 %v1608_v20  ;;  %v649_v20 = vunpack.c.0.s8 %v648_v19  ;;  %v1715_v19 = vld [vmem:[#allocation7 + $0x90] sm:$0xff]  }
  0xbd   :  { %1634 = vmatprep.subr.bf16.mxu0 %v1851_v0 }
  0xbe   :  { %v2087_v21 = vsub.s32 %v649_v20, %v1970_v3  ;;  %v1716_v20 = vld [vmem:[#allocation7 + $0x98] sm:$0xff]  }
  0xc0   :  { %1636 = vmatpush3.bf16.msra.mxu0 %v1611_v24 }
  0xc1   :  { %1637 = vmatprep.subr.bf16.mxu0 %v1851_v0 }
  0xc4   :  { %1639 = vmatpush3.bf16.msra.mxu0 %v1614_v28  ;;  %v2095_v28 = vsub.s32 0, %v1970_v3  ;;  %v1712_v3 = vld [vmem:[#allocation7 + $0x78] sm:$0xff]  }
  0xc5   :  { %1640 = vmatprep.subr.bf16.mxu0 %v1851_v0 }
  0xc8   :  { %1642 = vmatpush3.bf16.msra.mxu0 %v1617_v32 }
 0x17e   :  { %v2065_v33 = vpop.f32.mrb[0].mxu0 }
 0x17f   :  { %v2067_v34 = vpop.f32.mrb[1].mxu0  ;;  %v539_v0 = vmul.f32 %v2065_v33, %v2065_v33 }
 0x180   :  { %v2069_v35 = vpop.f32.mrb[2].mxu0  ;;  %v537_v37 = vmul.f32 %v2067_v34, %v2067_v34 }
 0x181   :  { %v2071_v36 = vpop.f32.mrb[3].mxu0  ;;  %v540_v42 = vmul.f32 %v2069_v35, %v2069_v35 }
 0x182   :  { %v528_v38 = vadd.f32 %v2071_v36, %v2067_v34  ;;  %v538_v39 = vmul.f32 %v2071_v36, %v2071_v36 }
 0x184   :  { %v529_v40 = vadd.f32 %v2065_v33, %v528_v38  ;;  %v541_v41 = vadd.f32 %v538_v39, %v537_v37 }
 0x186   :  { %v530_v43 = vadd.f32 %v2069_v35, %v529_v40  ;;  %v542_v44 = vadd.f32 %v541_v41, %v539_v0 }
 0x188   :  { %v531_v45 = vrot.slane %v530_v43, 4  ;;  %v543_v46 = vadd.f32 %v542_v44, %v540_v42 }
 0x18a   :  { %v532_v47 = vadd.f32 %v531_v45, %v530_v43  ;;  %v544_v48 = vrot.slane %v543_v46, 4 }
 0x18c   :  { %v533_v49 = vrot.slane %v532_v47, 2  ;;  %v545_v50 = vadd.f32 %v544_v48, %v543_v46 }
 0x18e   :  { %v534_v51 = vadd.f32 %v533_v49, %v532_v47  ;;  %v546_v52 = vrot.slane %v545_v50, 2 }
 0x190   :  { %v535_v53 = vrot.slane %v534_v51, 1  ;;  %v547_v54 = vadd.f32 %v546_v52, %v545_v50 }
 0x192   :  { %v548_v55 = vrot.slane %v547_v54, 1  ;;  %v536_v57 = vadd.f32 %v535_v53, %v534_v51 }
 0x194   :  { %v549_v58 = vadd.f32 %v548_v55, %v547_v54 }
 0x196   :  { %v551_v59 = vsel %vm550_vm12, %v536_v57, %v549_v58 }
 0x197   :  { %1498 = vmatmul.mubr.f32.vlgmr.msra.gmra.mrb[0].mxu1 %v551_v59 }
 0x198   :  { %1501 = vmatpush3.bf16.msra.mxu1 %v1697_v60 }
 0x199   :  { %1502 = vmatprep.subr.bf16.mxu1 %v1698_v61 }
 0x19c   :  { %1503 = vmatpush3.bf16.msra.mxu1 %v1698_v61 }
 0x19d   :  { %1504 = vmatprep.subr.bf16.mxu1 %v1699_v62 }
 0x1a0   :  { %1505 = vmatpush3.bf16.msra.mxu1 %v1699_v62 }
 0x1a1   :  { %1506 = vmatprep.subr.bf16.mxu1 %v1700_v63 }
 0x1a4   :  { %1507 = vmatpush3.bf16.msra.mxu1 %v1700_v63 }
 0x1a5   :  { %1508 = vmatprep.subr.bf16.mxu1 %v1701_v1 }
 0x1a8   :  { %1509 = vmatpush3.bf16.msra.mxu1 %v1701_v1  ;;  %v1706_v1 = vld [vmem:[#allocation7 + $0x48] sm:$0xff]  }
 0x1a9   :  { %1510 = vmatprep.subr.bf16.mxu1 %v1702_v2 }
 0x1ac   :  { %1511 = vmatpush3.bf16.msra.mxu1 %v1702_v2 }
 0x1ad   :  { %1512 = vmatprep.subr.bf16.mxu1 %v1703_v4 }
 0x1b0   :  { %1513 = vmatpush3.bf16.msra.mxu1 %v1703_v4 }
 0x1b1   :  { %1514 = vmatprep.subr.bf16.mxu1 %v1704_v5 }
 0x1b4   :  { %1515 = vmatpush3.bf16.msra.mxu1 %v1704_v5 }
 0x1b5   :  { %1520 = vmatprep.subr.bf16.mxu1 %v1705_v6 }
 0x26a   :  { %v634_v11 = vpop.f32.mrb[0].mxu1 }
 0x26b   :  { %v638_v12 = vmul.f32 %v634_v11, %v634_v11  ;;  %v1499_v13 = vpop.f32.mrb[1].mxu1 }
 0x26d   :  { %v640_v14 = vrot.slane %v638_v12, 7 }
 0x26f   :  { %v642_v15 = vsub.f32 %v634_v11, %v640_v14  ;;  %v1707_v14 = vld [vmem:[#allocation7 + $0x50] sm:$0xff]  }
 0x271   :  { %v644_v17 = vadd.f32 1e-05, %v642_v15  ;;  %v1709_v15 = vld [vmem:[#allocation7 + $0x60] sm:$0xff]  }
 0x273   :  { %1721 = vrsqrt.f32 %v644_v17  ;;  %v1711_v17 = vld [vmem:[#allocation7 + $0x70] sm:$0xff]  }
 0x27d   :  { %v1722_v22 = vpop.eup %1721 }
 0x27e   :  { %v653_v24 = vrot.slane %v1722_v22, %v2087_v21  ;;  %v1717_v22 = vld [vmem:[#allocation7 + $0xa0] sm:$0xff]  }
 0x280   :  { %v654_v25 = vcombine.high %v653_v24, %v653_v24  ;;  %v1718_v24 = vld [vmem:[#allocation7 + $0xa8] sm:$0xff]  }
 0x282   :  { %v661_v27 = vrot.slane %v654_v25, %v2087_v21  ;;  %v1719_v25 = vld [vmem:[#allocation7 + $0xb0] sm:$0xff]  }
 0x284   :  { %v663_v29 = vmul.f32 %v661_v27, %v643_v26  ;;  %v1720_v26 = vld [vmem:[#allocation7 + $0xb8] sm:$0xff]  }
 0x286   :  { %v665_v32 = vmul.f32 %v663_v29, %v634_v11  ;;  %v671_v37 = vrot.slane %v663_v29, %v2095_v28 }
 0x288   :  { %v666_v38 = vsub.f32 %v664_v31, %v665_v32  ;;  %v673_v39 = vmul.f32 %v671_v37, %v2067_v34  ;;  %v674_v0 = vmul.f32 %v671_v37, %v2071_v36  ;;  %v675_v40 = vmul.f32 %v2065_v33, %v671_v37 }
 0x289   :  { %v676_v41 = vmul.f32 %v2069_v35, %v671_v37 }
 0x28a   :  { %v681_v42 = vrot.slane %v666_v38, %v2095_v28 }
 0x28c   :  { %v683_v43 = vadd.f32 %v681_v42, %v673_v39  ;;  %v684_v44 = vadd.f32 %v681_v42, %v674_v0  ;;  %v685_v45 = vadd.f32 %v681_v42, %v675_v40  ;;  %v686_v46 = vadd.f32 %v681_v42, %v676_v41 }
 0x28e   :  { %v687_v47 = vmax.f32 %v683_v43, 0.0  ;;  %v688_v48 = vmax.f32 %v684_v44, 0.0  ;;  %v689_v49 = vmax.f32 %v685_v45, 0.0  ;;  %v690_v50 = vmax.f32 %v686_v46, 0.0 }
 0x290   :  { %v691_v51 = vrot.slane %v687_v47, 7  ;;  %v692_v52 = vrot.slane %v688_v48, 7  ;;  %v694_v53 = vrot.slane %v690_v50, 7  ;;  %v693_v34 = vrot.slane %v689_v49, 7 }
 0x291   :  { %v715_v54 = vpack.c.bf16 %v688_v48, %v687_v47  ;;  %v716_v36 = vpack.c.bf16 %v690_v50, %v689_v49  ;;  %v703_v55 = vrot.slane %v687_v47, 1  ;;  %v704_v33 = vrot.slane %v688_v48, 1 }
 0x292   :  { %v697_v35 = vsel %vm155_vm1, %v691_v51, %v692_v52  ;;  %v698_v57 = vsel %vm155_vm1, %v694_v53, %v691_v51  ;;  %v695_v58 = vsel %vm155_vm1, %v693_v34, %v694_v53  ;;  %v696_v59 = vsel %vm155_vm1, %v692_v52, %v693_v34 }
 0x293   :  { %v1284_v60 = vpack.c.bf16 %v697_v35, %v698_v57  ;;  %v1287_v61 = vpack.c.bf16 %v695_v58, %v696_v59  ;;  %v705_v62 = vrot.slane %v689_v49, 1  ;;  %v709_v63 = vsel %vm168_vm6, %v703_v55, %v704_v33 }
 0x294   :  { %v706_v2 = vrot.slane %v690_v50, 1 }
 0x295   :  { %1516 = vmatprep.mubr.msk.bf16.mxu1 %vm1988_vm3, %v1284_v60  ;;  %v708_v4 = vsel %vm168_vm6, %v704_v33, %v705_v62 }
 0x296   :  { %1517 = vmatmul.mubr.msk.bf16.vlgmr.msra.gmra.mrb[4].mxu1 %vm2003_vm5, %v1287_v61  ;;  %v1306_v5 = vpack.c.bf16 %v708_v4, %v709_v63  ;;  %v707_v11 = vsel %vm168_vm6, %v705_v62, %v706_v2  ;;  %v710_v12 = vsel %vm168_vm6, %v706_v2, %v703_v55  ;;  %v1164_v63 = vld [vmem:[%s2165_s5] sm:$0x1]  ;;  %s1856_s5 = smov [#allocation10]  }
 0x297   :  { %1521 = vmatpush3.bf16.msra.mxu1 %v1705_v6  ;;  %1536 = vmatprep.mubr.bf16.mxu1 %v715_v54  ;;  %v1309_v13 = vpack.c.bf16 %v710_v12, %v707_v11  ;;  %v1713_v6 = vld [vmem:[#allocation7 + $0x80] sm:$0xff]   ;;  %s1225_s18 = sshll.u32 %s1856_s5, 4  ;;  %s1226_s18 = int_to_ptr.vmem [resolvable:$true] %s1225_s18 }
 0x298   :  { %1522 = vmatprep.subr.bf16.mxu1 %v1706_v1  ;;  %v1185_v4 = vld [vmem:[%s2166_s6] sm:$0x1]  ;;  %s1813_s6 = scalar_lea.vmem %s1226_s18, 512  ;;  %p1818_p5 = scmp.lt.s32.totalorder %s1226_s18, %s1226_s18 }
 0x299   :  { %p1814_p4 = scmp.ne.s32.totalorder %s1226_s18, %s1813_s6  ;;  %p1819_p6 = scmp.lt.s32.totalorder %s1813_s6, %s1813_s6 }
 0x29b   :  { %1523 = vmatpush3.bf16.msra.mxu1 %v1706_v1  ;;  %p1820_p7 = por %p1819_p6, %p1818_p5 }
 0x29c   :  { %1524 = vmatprep.subr.bf16.mxu1 %v1707_v14 }
 0x29d   :  { %p1821_p8 = pnand %p1820_p7, %p1814_p4 }
 0x29f   :  { %1525 = vmatpush3.bf16.msra.mxu1 %v1707_v14 }
 0x2a0   :  { %1526 = vmatprep.subr.bf16.mxu1 %v1708_v16 }
 0x2a3   :  { %1527 = vmatpush3.bf16.msra.mxu1 %v1708_v16 }
 0x2a4   :  { %1528 = vmatprep.subr.bf16.mxu1 %v1709_v15 }
 0x2a7   :  { %1529 = vmatpush3.bf16.msra.mxu1 %v1709_v15 }
 0x2a8   :  { %1530 = vmatprep.subr.bf16.mxu1 %v1710_v30 }
 0x2ab   :  { %1531 = vmatpush3.bf16.msra.mxu1 %v1710_v30 }
 0x2ac   :  { %1532 = vmatprep.subr.bf16.mxu1 %v1711_v17 }
 0x2af   :  { %1533 = vmatpush3.bf16.msra.mxu1 %v1711_v17 }
 0x2b0   :  { %1534 = vmatprep.subr.bf16.mxu1 %v1712_v3 }
 0x2b3   :  { %1535 = vmatpush3.bf16.msra.mxu1 %v1712_v3 }
 0x2b4   :  { %1540 = vmatprep.subr.bf16.mxu1 %v1713_v6 }
 0x2b6   :  { %1537 = vmatmul.mubr.bf16.vlgmr.msra.gmra.mrb[4].mxu1 %v716_v36 }
 0x2b7   :  { %1541 = vmatpush3.bf16.msra.mxu1 %v1713_v6  ;;  %1556 = vmatprep.mubr.msk.bf16.mxu1 %vm2031_vm8, %v1306_v5 }
 0x2b8   :  { %1542 = vmatprep.subr.bf16.mxu1 %v1714_v18 }
 0x2bb   :  { %1543 = vmatpush3.bf16.msra.mxu1 %v1714_v18 }
 0x2bc   :  { %1544 = vmatprep.subr.bf16.mxu1 %v1715_v19 }
 0x2bf   :  { %1545 = vmatpush3.bf16.msra.mxu1 %v1715_v19 }
 0x2c0   :  { %1546 = vmatprep.subr.bf16.mxu1 %v1716_v20 }
 0x2c3   :  { %1547 = vmatpush3.bf16.msra.mxu1 %v1716_v20 }
 0x2c4   :  { %1548 = vmatprep.subr.bf16.mxu1 %v1717_v22 }
 0x2c7   :  { %1549 = vmatpush3.bf16.msra.mxu1 %v1717_v22 }
 0x2c8   :  { %1550 = vmatprep.subr.bf16.mxu1 %v1718_v24 }
 0x2cb   :  { %1551 = vmatpush3.bf16.msra.mxu1 %v1718_v24 }
 0x2cc   :  { %1552 = vmatprep.subr.bf16.mxu1 %v1719_v25 }
 0x2cf   :  { %1553 = vmatpush3.bf16.msra.mxu1 %v1719_v25 }
 0x2d0   :  { %1554 = vmatprep.subr.bf16.mxu1 %v1720_v26 }
 0x2d3   :  { %1555 = vmatpush3.bf16.msra.mxu1 %v1720_v26 }
 0x2d6   :  { %1557 = vmatmul.mubr.msk.bf16.vlgmr.msra.gmra.mrb[4].mxu1 %vm2044_vm10, %v1309_v13 }
 0x3a9   :  { %v1558_v56 = vpop.f32.mrb[4].mxu1 }
 0x3aa   :  { %v1047_v27 = vpop.f32.mrb[5].mxu1  ;;  %v1077_v39 = vmul.f32 %v1558_v56, %v1558_v56 }
 0x3ab   :  { %v1559_v29 = vpop.f32.mrb[6].mxu1  ;;  %v1075_v32 = vmul.f32 %v1047_v27, %v1047_v27 }
 0x3ac   :  { %v1050_v31 = vpop.f32.mrb[7].mxu1  ;;  %v1078_v41 = vmul.f32 %v1559_v29, %v1559_v29 }
 0x3ad   :  { %v1066_v37 = vadd.f32 %v1050_v31, %v1047_v27  ;;  %v1076_v38 = vmul.f32 %v1050_v31, %v1050_v31 }
 0x3af   :  { %v1067_v0 = vadd.f32 %v1558_v56, %v1066_v37  ;;  %v1079_v40 = vadd.f32 %v1076_v38, %v1075_v32 }
 0x3b1   :  { %v1068_v42 = vadd.f32 %v1559_v29, %v1067_v0  ;;  %v1080_v43 = vadd.f32 %v1079_v40, %v1077_v39 }
 0x3b3   :  { %v1069_v44 = vrot.slane %v1068_v42, 4  ;;  %v1081_v45 = vadd.f32 %v1080_v43, %v1078_v41 }
 0x3b5   :  { %v1070_v46 = vadd.f32 %v1069_v44, %v1068_v42  ;;  %v1082_v47 = vrot.slane %v1081_v45, 4 }
 0x3b7   :  { %v1071_v48 = vrot.slane %v1070_v46, 2  ;;  %v1083_v7 = vadd.f32 %v1082_v47, %v1081_v45 }
 0x3b9   :  { %v1072_v49 = vadd.f32 %v1071_v48, %v1070_v46  ;;  %v1084_v50 = vrot.slane %v1083_v7, 2 }
 0x3bb   :  { %v1073_v51 = vrot.slane %v1072_v49, 1  ;;  %v1085_v52 = vadd.f32 %v1084_v50, %v1083_v7 }
 0x3bd   :  { %v1086_v53 = vrot.slane %v1085_v52, 1  ;;  %v1074_v34 = vadd.f32 %v1073_v51, %v1072_v49 }
 0x3bf   :  { %v1087_v54 = vadd.f32 %v1086_v53, %v1085_v52 }
 0x3c1   :  { %v1088_v36 = vsel %vm550_vm12, %v1074_v34, %v1087_v54 }
 0x3c2   :  { %1593 = vmatmul.mubr.f32.vlgmr.msra.gmra.mrb[4].mxu0 %v1088_v36 }
 0x495   :  { %v1155_v55 = vpop.f32.mrb[4].mxu0 }
 0x496   :  { %v1159_v33 = vmul.f32 %v1155_v55, %v1155_v55  ;;  %v1594_v35 = vpop.f32.mrb[5].mxu0 }
 0x498   :  { %v1161_v57 = vrot.slane %v1159_v33, 7 }
 0x49a   :  { %v1163_v58 = vsub.f32 %v1155_v55, %v1161_v57 }
 0x49c   :  { %v1165_v59 = vadd.f32 1e-05, %v1163_v58 }
 0x49e   :  { %1723 = vrsqrt.f32 %v1165_v59 }
 0x4a8   :  { %v1724_v60 = vpop.eup %1723 }
 0x4a9   :  { %v1174_v61 = vrot.slane %v1724_v60, %v2087_v21 }
 0x4ab   :  { %v1175_v62 = vcombine.high %v1174_v61, %v1174_v61 }
 0x4ad   :  { %v1182_v1 = vrot.slane %v1175_v62, %v2087_v21 }
 0x4af   :  { %v1184_v2 = vmul.f32 %v1182_v1, %v1164_v63 }
 0x4b1   :  { %v1186_v5 = vmul.f32 %v1184_v2, %v1155_v55  ;;  %v1192_v11 = vrot.slane %v1184_v2, %v2095_v28 }
 0x4b3   :  { %v1187_v12 = vsub.f32 %v1185_v4, %v1186_v5  ;;  %v1194_v13 = vmul.f32 %v1192_v11, %v1047_v27  ;;  %v1195_v14 = vmul.f32 %v1192_v11, %v1050_v31  ;;  %v1196_v16 = vmul.f32 %v1558_v56, %v1192_v11 }
 0x4b4   :  { %v1197_v15 = vmul.f32 %v1559_v29, %v1192_v11 }
 0x4b5   :  { %v1202_v30 = vrot.slane %v1187_v12, %v2095_v28 }
 0x4b7   :  { %v1204_v17 = vadd.f32 %v1202_v30, %v1194_v13  ;;  %v1205_v3 = vadd.f32 %v1202_v30, %v1195_v14  ;;  %v1206_v6 = vadd.f32 %v1202_v30, %v1196_v16  ;;  %v1207_v18 = vadd.f32 %v1202_v30, %v1197_v15 }
 0x4b9   :  { %v1208_v21 = vadd.f32 %v1204_v17, %v1973_v8  ;;  %v1209_v19 = vadd.f32 %v1205_v3, %v1975_v9  ;;  %v1210_v20 = vadd.f32 %v1206_v6, %v1995_v23  ;;  %v1211_v22 = vadd.f32 %v1207_v18, %v1977_v10 }
 0x4bb   :  { %v1212_v24 = vmax.f32 %v1208_v21, 0.0  ;;  %v1213_v25 = vmax.f32 %v1209_v19, 0.0  ;;  %v1214_v26 = vmax.f32 %v1210_v20, 0.0  ;;  %v1215_v56 = vmax.f32 %v1211_v22, 0.0 }
 0x4bd   :  { %1216 = vst [vmem:[#allocation10] sm:$0xff] %v1212_v24  ;;  %1217 = vst [vmem:[#allocation10 + $0x8] sm:$0xff] %v1213_v25 }
 0x4be   :  { %1218 = vst [vmem:[#allocation10 + $0x10] sm:$0xff] %v1214_v26  ;;  %1219 = vst [vmem:[#allocation10 + $0x18] sm:$0xff] %v1215_v56 }
 0x4bf   :  { %1824 = shalt.err (!%p1821_p8)
}
 0x4c0   :  { %s1825_s22 = scalar_lea.hbm %s2168_s8, 512 }
 0x4c1   :  { %p1826_p9 = scmp.ne.s32.totalorder %s2168_s8, %s1825_s22  ;;  %p1829_p10 = scmp.lt.u32.totalorder %s1825_s22, %s2168_s8 }
 0x4c3   :  { %p1831_p11 = pnand %p1829_p10, %p1826_p9 }
 0x4c5   :  { %1834 = shalt.err (!%p1831_p11)
}
 0x4c6   :  { %1231 = dma.vmem_to_hbm [thread:$0]  %s1226_s18, 512, %s2168_s8, [#allocation4], %s1847_s1, %s1847_s1, %s1848_s28  }
 0x4c7   :  { %1841 = dma.done.wait [#allocation4], 512  }
 0x4c8   :  { %1842 = vsyncadd [#allocation4], 4294966784 }
 0x4c9   :  { %1235 = vsyncpa [#allocation3], 1 }
 0x4ca   :  { %1236 = vsyncpa [#allocation6], 1 }
 0x4cb   :  { %1237 = vsyncpa [#allocation9], 1 }
 0x4cc   :  { %1238 = vsyncpa [#allocation4], 1 }

</bundles_post_ra>
